<compile_context>
chip_gen: v5e
topology: v5e:2x2
jax: 0.10.0
libtpu: 0.0.40
codegen_flags: <defaults>
</compile_context>

<pallas_src>
import functools

import jax
import jax.numpy as jnp
from jax import lax
from jax.experimental import pallas as pl
from jax.experimental.pallas import tpu as pltpu


def _round_up(x, m):
    return ((x + m - 1) // m) * m


def _cdiv(a, b):
    return -(-a // b)


def _tpu_vmem_and_cores():
    """Best-effort hardware probe: (VMEM capacity bytes, TensorCores per chip)."""
    vmem = 0
    try:
        vmem = int(getattr(pltpu.get_tpu_info(), "vmem_capacity_bytes", 0))
    except Exception:
        vmem = 0
    if vmem <= 0:
        vmem = 64 * 1024 * 1024            # conservative floor (v7x per-TC VMEM)
    kind = ""
    try:
        kind = jax.devices()[0].device_kind.lower()
    except Exception:
        pass
    cores = 2 if "7" in kind else 1        # v7x has 2 TensorCores per chip
    return vmem, cores


def _choose_tiles(B, C, D, K, vmem_limit, cores, b_tile, c_tile):
    """Generation-aware tile sizes.

    bt: target 256 rows (fills the 256-wide MXU on v6e/v7x and halves prototype
        HBM re-streams vs 128) but capped so nb >= cores on multi-TC chips so
        the "parallel" batch axis actually shards across TensorCores.
    ct: largest lane-aligned class tile whose double-buffered bf16 prototype
        slab + f32 logits temp + featn block fits in ~half the VMEM limit.
    """
    if b_tile is None:
        bt = 256
        if cores >= 2:
            bt = min(bt, max(16, _round_up(_cdiv(B, cores), 16)))
    else:
        bt = int(b_tile)
    bt = max(8, min(_round_up(bt, 8), _round_up(B, 8)))

    if c_tile is None:
        budget = vmem_limit // 2
        fixed = 2 * bt * D * 2 + 8 * bt * 4          # featn double-buffer + out/acc
        ct = 512
        while ct > 128:
            need = (fixed
                    + 2 * D * K * ct * 2             # double-buffered bf16 slab
                    + bt * K * ct * 4                # f32 logits temp
                    + 2 * bt * ct * 4)               # logits_max / exp temps
            if need <= budget:
                break
            ct -= 128
    else:
        ct = int(c_tile)
    ct = max(128, min(_round_up(ct, 128), _round_up(C, 128)))
    return bt, ct


def _psc_kernel(featn_ref, protos_ref, out_ref, neg_acc, *,
                k, c_tile, num_classes, mask_padded_classes):
    # featn_ref:  (bt, D)    bf16  L2-normalized rows with 1/temp folded in
    # protos_ref: (D, K*ct)  bf16  columns ordered j*ct + c_local
    # out_ref:    (bt, 1)    f32   sum over valid classes of exp(logits_max)
    # neg_acc:    (bt, 1)    f32   scratch accumulator across class tiles
    ci = pl.program_id(1)

    @pl.when(ci == 0)
    def _init():
        neg_acc[...] = jnp.zeros_like(neg_acc)

    # One fused MXU contraction over all K prototype slots of this class tile.
    logits = jnp.dot(featn_ref[...], protos_ref[...],
                     preferred_element_type=jnp.float32)          # (bt, K*ct) f32

    # Single pass over the logits buffer: running max over the K slots.
    # Slices land on 128-lane boundaries; K is small & static.
    logits_max = logits[:, :c_tile]
    for j in range(1, k):
        logits_max = jnp.maximum(logits_max, logits[:, j * c_tile:(j + 1) * c_tile])
    # TODO(synk): use lax.fori_loop for very large K.

    # NOTE: matches the PyTorch module -- no log-sum-exp stabilization; very
    # small temp can overflow exp() exactly as the reference would.
    if mask_padded_classes:
        cls = lax.broadcasted_iota(jnp.int32, logits_max.shape, 1) + ci * c_tile
        contrib = jnp.where(cls < num_classes, jnp.exp(logits_max), 0.0)
    else:
        contrib = jnp.exp(logits_max)

    neg_acc[...] += jnp.sum(contrib, axis=1, keepdims=True)

    @pl.when(ci == pl.num_programs(1) - 1)
    def _finalize():
        out_ref[...] = neg_acc[...]


def pack_prototypes(prototypes, c_tile=512):
    """(C, K, D) prototypes -> lane-dense bf16 (D, nc*K*ct) slab + static ct.

    Cache the returned pair across loss calls (prototypes change slowly) so the
    cast+pad+transpose pass stays off the training-step critical path.
    """
    C, K, D = prototypes.shape
    ct = max(128, min(_round_up(c_tile, 128), _round_up(C, 128)))
    c_pad = _round_up(C, ct)
    nc = c_pad // ct
    p = jnp.pad(prototypes.astype(jnp.bfloat16), ((0, c_pad - C), (0, 0), (0, 0)))
    p = p.reshape(nc, ct, K, D)
    p = jnp.transpose(p, (3, 0, 2, 1)).reshape(D, nc * K * ct)
    return p, ct


def psc_loss(feat, label, prototypes, probs=None, temp=0.1, *,
             b_tile=None, c_tile=None, packed_prototypes=None):
    """Pallas implementation of PSCLoss.forward (default flags).

    feat:       (B, D) float32
    label:      (B,)   int32
    prototypes: (C, K, D) float32   (same layout as the PyTorch module)
    probs:      unused in the default path (kept for signature fidelity)
    packed_prototypes: optional (slab, ct) from pack_prototypes() to reuse
                       the prototype re-layout across calls.
    """
    del probs  # only used by the discriminative branch (not implemented)
    B, D = feat.shape
    C, K, Dp = prototypes.shape
    assert Dp == D

    vmem_cap, cores = _tpu_vmem_and_cores()
    vmem_limit = max(32 << 20, min(vmem_cap * 3 // 4, 96 << 20))

    if packed_prototypes is not None:
        p, ct = packed_prototypes
        bt, _ = _choose_tiles(B, C, D, K, vmem_limit, cores, b_tile, ct)
    else:
        bt, ct = _choose_tiles(B, C, D, K, vmem_limit, cores, b_tile, c_tile)
        p, ct = pack_prototypes(prototypes, ct)

    b_pad = _round_up(B, bt)
    nb = b_pad // bt
    c_pad = p.shape[1] // K                      # nc * ct
    nc = c_pad // ct

    inv_temp = 1.0 / float(temp)

    # --- per-call prep in JAX (reused by both the kernel and the GT path) ----
    # L2-normalize rows (F.normalize eps=1e-12), fold 1/temp, single bf16 cast.
    nrm = jnp.sqrt(jnp.sum(feat.astype(jnp.float32) ** 2, axis=1, keepdims=True))
    featn = (feat * (inv_temp / jnp.maximum(nrm, 1e-12))).astype(jnp.bfloat16)

    # positive / GT terms are O(B*K*D): gather + tiny einsum with the SAME bf16
    # operands as the kernel so the "- exp(positive)" cancellation matches.
    proto_lab = prototypes.astype(jnp.bfloat16)[label]              # (B, K, D)
    gt = jnp.einsum('bd,bkd->bk', featn, proto_lab,
                    preferred_element_type=jnp.float32)             # (B, K)
    positive = jnp.max(gt, axis=1)                    # == logits_max[b, label[b]]
    gt_term = jnp.sum(jnp.exp(gt), axis=1) - jnp.exp(positive)      # (B,)

    featn_p = jnp.pad(featn, ((0, b_pad - B), (0, 0)))

    kernel = functools.partial(
        _psc_kernel, k=K, c_tile=ct, num_classes=C,
        mask_padded_classes=(c_pad != C))

    cost = pl.CostEstimate(
        flops=2 * b_pad * c_pad * K * D,
        transcendentals=b_pad * c_pad,
        # prototypes are re-streamed once per batch tile
        bytes_accessed=nb * p.size * 2 + featn_p.size * 2 + b_pad * 4)

    neg_max_sum = pl.pallas_call(
        kernel,
        out_shape=jax.ShapeDtypeStruct((b_pad, 1), jnp.float32),
        grid_spec=pltpu.PrefetchScalarGridSpec(
            num_scalar_prefetch=0,
            grid=(nb, nc),                     # (batch parallel, class reduction)
            in_specs=[
                # featn block stays resident across the class axis (same index)
                pl.BlockSpec((bt, D), lambda bi, ci: (bi, 0)),
                # TODO(synk): pipeline_mode=pl.Buffered(3) on this slab for v5e,
                #             where the slab DMA is harder to hide behind the MXU.
                pl.BlockSpec((D, K * ct), lambda bi, ci: (0, ci)),
            ],
            out_specs=pl.BlockSpec((bt, 1), lambda bi, ci: (bi, 0)),
            scratch_shapes=[pltpu.VMEM((bt, 1), jnp.float32)],      # neg accumulator
        ),
        compiler_params=pltpu.CompilerParams(
            dimension_semantics=("parallel", "arbitrary"),
            vmem_limit_bytes=vmem_limit),
        cost_estimate=cost,
    )(featn_p, p)

    # mean / negation over the true (unpadded) batch done in JAX so batch
    # tiling stays correct for any B.
    neg = neg_max_sum[:B, 0] + gt_term
    return -jnp.mean(positive - jnp.log(neg))


def psc_loss_ref(feat, label, prototypes, temp=0.1):
    """Pure-JAX f32 reference mirroring the PyTorch default path."""
    featn = feat / jnp.maximum(
        jnp.linalg.norm(feat, axis=1, keepdims=True), 1e-12)
    C, K, _ = prototypes.shape
    mask = jax.nn.one_hot(label, C, dtype=jnp.float32)                  # (B, C)
    logits = jnp.einsum('ckd,bd->bck', prototypes, featn) / temp        # (B, C, K)
    logits_max = jnp.max(logits, axis=2)                                # (B, C)
    positive = jnp.sum(logits_max * mask, axis=1)                       # (B,)
    gt = jnp.sum(logits * mask[:, :, None], axis=1)                     # (B, K)
    neg = (jnp.sum(jnp.exp(logits_max), axis=1)
           + jnp.sum(jnp.exp(gt), axis=1)
           - jnp.exp(positive))
    return -jnp.mean(positive - jnp.log(neg))


if __name__ == "__main__":
    key = jax.random.PRNGKey(0)
    k_feat, k_proto, k_label = jax.random.split(key, 3)

    B, D = 8, 32       # batch, feature dim
    C, K = 8, 4        # num_classes, prototypes per class
    temp = 0.1

    feat = jax.random.normal(k_feat, (B, D), dtype=jnp.float32)
    prototypes = jax.random.normal(k_proto, (C, K, D), dtype=jnp.float32)
    prototypes = prototypes / jnp.linalg.norm(prototypes, axis=-1, keepdims=True)
    label = jax.random.randint(k_label, (B,), 0, C, dtype=jnp.int32)
    probs = jax.nn.softmax(jax.random.normal(key, (B, C), dtype=jnp.float32), axis=-1)

    loss_fn = jax.jit(functools.partial(psc_loss, temp=temp))
    out = loss_fn(feat, label, prototypes, probs)
    out = jax.block_until_ready(out)

    ref = psc_loss_ref(feat, label, prototypes, temp=temp)
    # Kernel uses bf16 MXU operands (per perf review) -> tolerance vs f32 ref.
    assert jnp.allclose(out, ref, rtol=5e-2, atol=5e-2), (out, ref)

    print("KERNEL_OK")
</pallas_src>

<mosaic_0001>
module attributes {stable_mosaic.version = 11 : i64} {
  func.func @_psc_kernel(%arg0: i32, %arg1: i32, %arg2: memref<8x32xbf16, #tpu.memory_space<vmem>>, %arg3: memref<32x512xbf16, #tpu.memory_space<vmem>>, %arg4: memref<8x1xf32, #tpu.memory_space<vmem>>, %arg5: memref<8x1xf32, #tpu.memory_space<vmem>>) attributes {dimension_semantics = [#tpu.dimension_semantics<parallel>, #tpu.dimension_semantics<arbitrary>], iteration_bounds = array<i64: 1, 1>, scalar_prefetch = 0 : i64, scratch_operands = 1 : i64, tpu.core_type = #tpu.core_type<tc>, window_params = [{transform_indices = @transform_0, window_bounds = array<i64: 8, 32>}, {transform_indices = @transform_1, window_bounds = array<i64: 32, 512>}, {transform_indices = @transform_2, window_bounds = array<i64: 8, 1>}]} {
    %c0_i32 = arith.constant 0 : i32
    %0 = arith.cmpi eq, %arg1, %c0_i32 : i32
    %1 = arith.extui %0 : i1 to i32
    %c0_i32_0 = arith.constant 0 : i32
    %2 = arith.cmpi ne, %1, %c0_i32_0 : i32
    scf.if %2 {
      %cst_12 = arith.constant 0.000000e+00 : f32
      %30 = vector.broadcast %cst_12 : f32 to vector<8x1xf32>
      %c0_13 = arith.constant 0 : index
      %c0_14 = arith.constant 0 : index
      %31 = vector.load %arg5[%c0_13, %c0_14] : memref<8x1xf32, #tpu.memory_space<vmem>>, vector<8x1xf32>
      tpu.vector_store %arg5[%c0_13, %c0_14], %30 {strides = array<i32>} : memref<8x1xf32, #tpu.memory_space<vmem>>, vector<8x1xf32>,
    } else {
    }
    %c0 = arith.constant 0 : index
    %c0_1 = arith.constant 0 : index
    %3 = vector.load %arg2[%c0, %c0_1] : memref<8x32xbf16, #tpu.memory_space<vmem>>, vector<8x32xbf16>
    %c0_2 = arith.constant 0 : index
    %c0_3 = arith.constant 0 : index
    %4 = vector.load %arg3[%c0_2, %c0_3] : memref<32x512xbf16, #tpu.memory_space<vmem>>, vector<32x512xbf16>
    %cst = arith.constant dense<0.000000e+00> : vector<8x512xf32>
    %5 = tpu.matmul %3, %4, %cst {dimension_numbers = #tpu.dot_dimension_numbers<[1], [0], [0], [1], [0, 0, 1, 1], [], []>} : vector<8x32xbf16>, vector<32x512xbf16>, vector<8x512xf32> -> vector<8x512xf32>
    %6 = vector.extract_strided_slice %5 {offsets = [0, 0], sizes = [8, 128], strides = [1, 1]} : vector<8x512xf32> to vector<8x128xf32>
    %7 = vector.extract_strided_slice %5 {offsets = [0, 128], sizes = [8, 128], strides = [1, 1]} : vector<8x512xf32> to vector<8x128xf32>
    %8 = arith.maximumf %6, %7 : vector<8x128xf32>
    %9 = vector.extract_strided_slice %5 {offsets = [0, 256], sizes = [8, 128], strides = [1, 1]} : vector<8x512xf32> to vector<8x128xf32>
    %10 = arith.maximumf %8, %9 : vector<8x128xf32>
    %11 = vector.extract_strided_slice %5 {offsets = [0, 384], sizes = [8, 128], strides = [1, 1]} : vector<8x512xf32> to vector<8x128xf32>
    %12 = arith.maximumf %10, %11 : vector<8x128xf32>
    %13 = tpu.iota {dimensions = array<i32: 1>} : vector<8x128xi32>
    %c128_i32 = arith.constant 128 : i32
    %14 = arith.muli %arg1, %c128_i32 : i32
    %15 = vector.broadcast %14 : i32 to vector<8x128xi32>
    %16 = arith.addi %13, %15 : vector<8x128xi32>
    %c8_i32 = arith.constant 8 : i32
    %17 = vector.broadcast %c8_i32 : i32 to vector<8x128xi32>
    %18 = arith.cmpi slt, %16, %17 : vector<8x128xi32>
    %19 = math.exp %12 : vector<8x128xf32>
    %cst_4 = arith.constant 0.000000e+00 : f32
    %20 = vector.broadcast %cst_4 : f32 to vector<8x128xf32>
    %21 = arith.select %18, %19, %20 : vector<8x128xi1>, vector<8x128xf32>
    %c0_5 = arith.constant 0 : index
    %c0_6 = arith.constant 0 : index
    %22 = vector.load %arg5[%c0_5, %c0_6] : memref<8x1xf32, #tpu.memory_space<vmem>>, vector<8x1xf32>
    %cst_7 = arith.constant dense<0.000000e+00> : vector<8xf32>
    %23 = vector.multi_reduction <add>, %21, %cst_7 [1] : vector<8x128xf32> to vector<8xf32>
    %24 = vector.shape_cast %23 : vector<8xf32> to vector<8x1xf32>
    %25 = arith.addf %22, %24 : vector<8x1xf32>
    %c0_8 = arith.constant 0 : index
    %c0_9 = arith.constant 0 : index
    %26 = vector.load %arg5[%c0_8, %c0_9] : memref<8x1xf32, #tpu.memory_space<vmem>>, vector<8x1xf32>
    tpu.vector_store %arg5[%c0_8, %c0_9], %25 {strides = array<i32>} : memref<8x1xf32, #tpu.memory_space<vmem>>, vector<8x1xf32>,
    %c0_i32_10 = arith.constant 0 : i32
    %27 = arith.cmpi eq, %arg1, %c0_i32_10 : i32
    %28 = arith.extui %27 : i1 to i32
    %c0_i32_11 = arith.constant 0 : i32
    %29 = arith.cmpi ne, %28, %c0_i32_11 : i32
    scf.if %29 {
      %c0_12 = arith.constant 0 : index
      %c0_13 = arith.constant 0 : index
      %30 = vector.load %arg5[%c0_12, %c0_13] : memref<8x1xf32, #tpu.memory_space<vmem>>, vector<8x1xf32>
      %c0_14 = arith.constant 0 : index
      %c0_15 = arith.constant 0 : index
      %31 = vector.load %arg4[%c0_14, %c0_15] : memref<8x1xf32, #tpu.memory_space<vmem>>, vector<8x1xf32>
      tpu.vector_store %arg4[%c0_14, %c0_15], %30 {strides = array<i32>} : memref<8x1xf32, #tpu.memory_space<vmem>>, vector<8x1xf32>,
    } else {
    }
    return
  }
  func.func @transform_0(%arg0: i32, %arg1: i32) -> (i32, i32) {
    %c0_i32 = arith.constant 0 : i32
    %c0_i32_0 = arith.constant 0 : i32
    return %arg0, %c0_i32 : i32, i32
  }
  func.func @transform_1(%arg0: i32, %arg1: i32) -> (i32, i32) {
    %c0_i32 = arith.constant 0 : i32
    %c0_i32_0 = arith.constant 0 : i32
    return %c0_i32, %arg1 : i32, i32
  }
  func.func @transform_2(%arg0: i32, %arg1: i32) -> (i32, i32) {
    %c0_i32 = arith.constant 0 : i32
    %c0_i32_0 = arith.constant 0 : i32
    return %arg0, %c0_i32 : i32, i32
  }
}

</mosaic_0001>

<bundles_post_ra>
// kernel: psc_loss.1
= control target key start
LH: loop header
LB: loop body
LE: loop exit
PB: predicated region body
PF: predicated region fallthrough
CT: control target
= control target key end

     0   :  { %vm67_vm0 = vcmask 261120   ;;  %vm16_vm1 = vcmask 7168   ;;  %v197_v25 = vmov 0.0   ;;  %v126_v35 = vlaneseq  ;;  %s270_s1 = inlined_call_operand.vmem [shape: bf16[32,512], index: 1, kind: input, shape index: {}]   ;;  %s271_s0 = inlined_call_operand.vmem [shape: bf16[8,32], index: 0, kind: input, shape index: {}]   ;;  %s272_s2 = inlined_call_operand.vmem [shape: f32[8,1], index: 2, kind: output, shape index: {}]  }
   0x1   :  { %v168_v0 = vld [vmem:[%s270_s1 + $0x20] sm:$0xf]  ;;  %v192_v1 = vld [vmem:[%s270_s1 + $0x2c] sm:$0xf0]  ;;  %v190_v2 = vld [vmem:[%s270_s1 + $0x24] sm:$0xf] }
   0x2   :  { %v169_v3 = vor.u32 %v192_v1, %v168_v0  ;;  %v170_v4 = vld [vmem:[%s270_s1 + $0x30] sm:$0xf0]  ;;  %v176_v5 = vld [vmem:[%s270_s1 + $0x28] sm:$0xf]  ;;  %v193_v6 = vld [vmem:[%s270_s1 + $0x34] sm:$0xf0] }
   0x3   :  { %v173_v7 = vor.u32 %v190_v2, %v170_v4  ;;  %v177_v8 = vor.u32 %v193_v6, %v176_v5  ;;  %v191_v9 = vld [vmem:[%s270_s1 + $0x2c] sm:$0xf]  ;;  %v178_v10 = vld [vmem:[%s270_s1 + $0x38] sm:$0xf0]  ;;  %v152_v11 = vld [vmem:[%s270_s1] sm:$0xf] }
   0x4   :  { %77 = vmatpush.bf16.msra.mxu0 %v169_v3  ;;  %v181_v12 = vor.u32 %v191_v9, %v178_v10  ;;  %v188_v13 = vld [vmem:[%s270_s1 + $0xc] sm:$0xf0]  ;;  %v186_v14 = vld [vmem:[%s270_s1 + $0x4] sm:$0xf]  ;;  %v154_v15 = vld [vmem:[%s270_s1 + $0x10] sm:$0xf0] }
   0x5   :  { %90 = vmatpush.bf16.msra.mxu1 %v173_v7  ;;  %103 = vmatpush.bf16.msra.mxu2 %v177_v8  ;;  %v153_v16 = vor.u32 %v188_v13, %v152_v11  ;;  %v157_v17 = vor.u32 %v186_v14, %v154_v15  ;;  %v160_v18 = vld [vmem:[%s270_s1 + $0x8] sm:$0xf]  ;;  %v189_v19 = vld [vmem:[%s270_s1 + $0x14] sm:$0xf0]  ;;  %v187_v20 = vld [vmem:[%s270_s1 + $0xc] sm:$0xf] }
   0x6   :  { %116 = vmatpush.bf16.msra.mxu3 %v181_v12  ;;  %v161_v21 = vor.u32 %v189_v19, %v160_v18  ;;  %v162_v22 = vld [vmem:[%s270_s1 + $0x18] sm:$0xf0]  ;;  %v18_v24 = vld [vmem:[%s271_s0] sm:$0xf]  ;;  %17 = vst.msk [vmem:[#allocation2] sm:$0xff] %vm16_vm1, %v197_v25  ;;  %v127_v37 = vand.u32 127, %v126_v35 }
   0x7   :  { %v165_v23 = vor.u32 %v187_v20, %v162_v22 }
   0x8   :  { %78 = vmatpush.bf16.msra.mxu0 %v153_v16  ;;  %vm131_vm2 = vcmp.lt.s32.totalorder %v127_v37, 8 }
   0x9   :  { %91 = vmatpush.bf16.msra.mxu1 %v157_v17  ;;  %104 = vmatpush.bf16.msra.mxu2 %v161_v21 }
   0xa   :  { %117 = vmatpush.bf16.msra.mxu3 %v165_v23 }
   0xb   :  { %182 = vmatmul.msk.bf16.vlgmr.msra.gmra.mxu0 %vm67_vm0, %v18_v24 }
   0xc   :  { %183 = vmatmul.msk.bf16.vlgmr.msra.gmra.mxu1 %vm67_vm0, %v18_v24  ;;  %184 = vmatmul.msk.bf16.vlgmr.msra.gmra.mxu2 %vm67_vm0, %v18_v24 }
   0xd   :  { %185 = vmatmul.msk.bf16.vlgmr.msra.gmra.mxu3 %vm67_vm0, %v18_v24  ;;  %v135_v42 = vld [vmem:[#allocation2] sm:$0xff] }
  0x88   :  { %v80_v26 = vpop.f32.mrf.mxu0 }
  0x89   :  { %v93_v27 = vpop.f32.mrf.mxu1 }
  0x8a   :  { %v123_v28 = vmax.f32 %v80_v26, %v93_v27 }
  0x8f   :  { %v106_v29 = vpop.f32.mrf.mxu2 }
  0x90   :  { %v124_v30 = vmax.f32 %v123_v28, %v106_v29  ;;  %v119_v31 = vpop.f32.mrf.mxu3  ;;  %v82_v32 = vpop.f32.mrf.mxu0 }
  0x91   :  { %v95_v33 = vpop.f32.mrf.mxu1 }
  0x92   :  { %v125_v34 = vmax.f32 %v124_v30, %v119_v31 }
  0x94   :  { %v132_v36 = vmul.f32 1.442695, %v125_v34 }
  0x96   :  { %195 = vpow2.f32 %v132_v36 }
  0x97   :  { %v108_v38 = vpop.f32.mrf.mxu2 }
  0x98   :  { %v121_v39 = vpop.f32.mrf.mxu3 }
  0x9c   :  { %v196_v40 = vpop.eup %195 }
  0x9d   :  { %v134_v41 = vsel %vm131_vm2, %v196_v40, 0.0 }
  0x9e   :  { %136 = vadd.xlane.f32.xlu0 %v134_v41 }
 0x111   :  { %v137_v43 = vpop.xlane.xlu0 %136 }
 0x112   :  { %v138_v44 = vadd.f32 %v137_v43, %v135_v42 }
 0x114   :  { %140 = vst.msk [vmem:[#allocation2] sm:$0xff] %vm16_vm1, %v138_v44 }
 0x11b   :  { %v144_v45 = vld [vmem:[#allocation2] sm:$0xff] }
 0x11c   :  { %145 = vst.msk [vmem:[%s272_s2] sm:$0xff] %vm16_vm1, %v144_v45 }

</bundles_post_ra>
